<compile_context>
chip_gen: v7x
topology: tpu7x:2x2x1
jax: 0.10.0
libtpu: 0.0.40
codegen_flags: <defaults>
</compile_context>

<pallas_src>
import math
import functools

import jax
import jax.numpy as jnp
from jax import lax
from jax.experimental import pallas as pl
from jax.experimental.pallas import tpu as pltpu


_M1 = 0x9E3779B1
_M2 = 0x85EBCA6B
_M3 = 0xC2B2AE35


def _hash_u32(x):
    """murmur3-style finalizer: uint32 array -> well-mixed uint32 bits (pure VPU ops)."""
    x = x * jnp.uint32(_M1)
    x = x ^ (x >> jnp.uint32(16))
    x = x * jnp.uint32(_M2)
    x = x ^ (x >> jnp.uint32(13))
    x = x * jnp.uint32(_M3)
    x = x ^ (x >> jnp.uint32(16))
    return x


def _dropout_keep_mask(seed_u32, row0_u32, shape, keep_prob):
    """Deterministic, grid-invariant keep mask for a (rows, cols) tile whose first global
    row index is row0_u32.  Uses only basic jnp ops so it works both on TPU (Mosaic) and
    in interpret mode."""
    rows, cols = shape
    r = lax.broadcasted_iota(jnp.int32, shape, 0).astype(jnp.uint32) + row0_u32
    c = lax.broadcasted_iota(jnp.int32, shape, 1).astype(jnp.uint32)
    idx = r * jnp.uint32(cols) + c  # global element index (wraps only past 2^32 elements)
    h = _hash_u32(idx ^ (seed_u32 * jnp.uint32(_M2) + jnp.uint32(1)))
    thresh = jnp.uint32(min(int(round(keep_prob * 2.0 ** 32)), 2 ** 32 - 1))
    return h < thresh


def _pe_dropout_kernel(seed_ref, x_ref, pe_ref, o_ref, *,
                       keep_prob, apply_dropout, seq_tile):
    # x_ref / pe_ref / o_ref: (TS, B*D) VMEM tiles (lane-dense 2-D slab).
    y = x_ref[...] + pe_ref[...]

    if apply_dropout:
        # Inverted dropout: keep with prob keep_prob, scale kept values by 1/keep_prob.
        # TODO(synk): PyTorch's dropout RNG stream cannot be reproduced bit-exactly; we
        #             use a deterministic counter-based hash of (seed, global index).
        row0 = (pl.program_id(0) * seq_tile).astype(jnp.uint32)
        seed_u32 = seed_ref[0].astype(jnp.uint32)
        keep = _dropout_keep_mask(seed_u32, row0, y.shape, keep_prob)
        y = jnp.where(keep, y, 0.0) * jnp.float32(1.0 / keep_prob)

    o_ref[...] = y.astype(o_ref.dtype)


def make_positional_encoding(max_seq_len: int, d_model: int) -> jnp.ndarray:
    """Deterministic buffer setup, same math as the PyTorch __init__ (batch_first=False)."""
    position = jnp.arange(max_seq_len, dtype=jnp.float32)[:, None]             # (L, 1)
    div_term = jnp.exp(
        jnp.arange(0, d_model, 2, dtype=jnp.float32) * (-math.log(10000.0) / d_model)
    )                                                                           # (D/2,)
    pe = jnp.zeros((max_seq_len, 1, d_model), dtype=jnp.float32)
    pe = pe.at[:, 0, 0::2].set(jnp.sin(position * div_term))
    pe = pe.at[:, 0, 1::2].set(jnp.cos(position * div_term))
    return pe


def _choose_seq_tile(S, row_bytes, target_bytes=2 << 20):
    """~2 MiB input tiles (multiple of 8 rows) so the pipeline double-buffers and total
    live VMEM (2x in + 2x pe + 2x out tiles ~= 12 MiB) stays under the scoped default on
    every generation (16 MiB v5e, 32 MiB v6e/v7x)."""
    if S <= 8:
        return S
    ts = (target_bytes // max(row_bytes, 1)) // 8 * 8
    ts = max(8, ts)
    return S if ts >= S else ts


def positional_encoder_forward(x, pe, *, dropout_p=0.1, train=True, seed=0,
                               seq_tile=None, out_dtype=None):
    """x: (S, B, D) float32, pe: (max_seq_len, 1, D).  Returns (S, B, D).

    out_dtype can be set to jnp.bfloat16 to halve write traffic if the consumer runs in bf16.
    """
    S, B, D = x.shape
    assert pe.shape[0] >= S and pe.shape[-1] == D
    out_dtype = x.dtype if out_dtype is None else out_dtype

    # Lane-dense 2-D slab: free row-major view of x; PE duplicated across the batch so a
    # single 2-D tile covers all batch elements with full (8,128)-shaped vregs.
    W = B * D
    x2 = x.reshape(S, W)
    pe_rows = jnp.tile(pe[:S, 0, :], (1, B))          # (S, W), a few KiB of cheap glue

    row_bytes = W * x2.dtype.itemsize
    TS = seq_tile if seq_tile is not None else _choose_seq_tile(S, row_bytes)
    grid = (pl.cdiv(S, TS),)

    apply_dropout = bool(train) and float(dropout_p) > 0.0
    keep_prob = 1.0 - float(dropout_p)
    if apply_dropout and keep_prob <= 0.0:
        # dropout_p == 1.0: everything is dropped.
        return jnp.zeros((S, B, D), dtype=out_dtype)

    kernel = functools.partial(
        _pe_dropout_kernel,
        keep_prob=keep_prob,
        apply_dropout=apply_dropout,
        seq_tile=TS,
    )

    seed_arr = jnp.asarray([seed], dtype=jnp.int32)

    itemsize = jnp.dtype(x2.dtype).itemsize
    bytes_accessed = (S * W * itemsize) * 2 + S * W * jnp.dtype(out_dtype).itemsize
    cost = pl.CostEstimate(flops=2 * S * W, transcendentals=0,
                           bytes_accessed=bytes_accessed)

    grid_spec = pltpu.PrefetchScalarGridSpec(
        num_scalar_prefetch=1,
        grid=grid,
        in_specs=[
            pl.BlockSpec((TS, W), lambda i, seed_ref: (i, 0)),   # x tile
            pl.BlockSpec((TS, W), lambda i, seed_ref: (i, 0)),   # pe tile
        ],
        out_specs=pl.BlockSpec((TS, W), lambda i, seed_ref: (i, 0)),
    )

    out2 = pl.pallas_call(
        kernel,
        out_shape=jax.ShapeDtypeStruct((S, W), out_dtype),
        grid_spec=grid_spec,
        compiler_params=pltpu.CompilerParams(
            # Tiles are fully independent -> lets v7x shard the grid across both
            # TensorCores; free/no-op on single-TC v5e/v6e.
            dimension_semantics=("parallel",),
        ),
        cost_estimate=cost,
    )(seed_arr, x2, pe_rows)

    return out2.reshape(S, B, D)


if __name__ == "__main__":
    # Small shapes consistent with the module (seq-first since batch_first=False).
    SEQ, BATCH, D_MODEL = 8, 2, 128
    MAX_SEQ_LEN = 64
    DROPOUT_P = 0.1
    SEED = 0

    key = jax.random.PRNGKey(0)
    x = jax.random.normal(key, (SEQ, BATCH, D_MODEL), dtype=jnp.float32)
    pe = make_positional_encoding(MAX_SEQ_LEN, D_MODEL)

    # Training-mode forward (PE add + dropout) through the Pallas kernel.
    out = positional_encoder_forward(x, pe, dropout_p=DROPOUT_P, train=True, seed=SEED)
    out = jax.block_until_ready(out)
    assert out.shape == (SEQ, BATCH, D_MODEL)

    # Eval-mode (dropout disabled) path: check against the pure-JAX reference.
    out_eval = positional_encoder_forward(x, pe, dropout_p=DROPOUT_P, train=False, seed=SEED)
    out_eval = jax.block_until_ready(out_eval)
    ref_eval = x + pe[:SEQ]  # broadcast (S, 1, D) over batch
    assert jnp.allclose(out_eval, ref_eval, atol=1e-6), "eval-mode mismatch"

    # Training-mode check: the keep mask is a deterministic, grid-invariant function of
    # (seed, global index), so we can replicate it exactly in plain JAX.
    W = BATCH * D_MODEL
    x2 = x.reshape(SEQ, W)
    pe_rows = jnp.tile(pe[:SEQ, 0, :], (1, BATCH))
    keep = _dropout_keep_mask(jnp.uint32(SEED), jnp.uint32(0), (SEQ, W), 1.0 - DROPOUT_P)
    ref_train = (jnp.where(keep, x2 + pe_rows, 0.0) * (1.0 / (1.0 - DROPOUT_P)))
    ref_train = ref_train.reshape(SEQ, BATCH, D_MODEL)
    assert jnp.allclose(out, ref_train, atol=1e-5), "dropout-mode mismatch"

    print("KERNEL_OK")
</pallas_src>

<mosaic_0001>
module attributes {stable_mosaic.version = 11 : i64} {
  func.func @_pe_dropout_kernel(%arg0: i32, %arg1: memref<1xi32, #tpu.memory_space<smem>>, %arg2: memref<8x256xf32, #tpu.memory_space<vmem>>, %arg3: memref<8x256xf32, #tpu.memory_space<vmem>>, %arg4: memref<8x256xf32, #tpu.memory_space<vmem>>) attributes {dimension_semantics = [#tpu.dimension_semantics<parallel>], iteration_bounds = array<i64: 1>, scalar_prefetch = 1 : i64, scratch_operands = 0 : i64, tpu.core_type = #tpu.core_type<tc>, window_params = [{transform_indices = @transform_0, window_bounds = array<i64: 8, 256>}, {transform_indices = @transform_1, window_bounds = array<i64: 8, 256>}, {transform_indices = @transform_2, window_bounds = array<i64: 8, 256>}]} {
    %c0 = arith.constant 0 : index
    %c0_0 = arith.constant 0 : index
    %0 = vector.load %arg2[%c0, %c0_0] : memref<8x256xf32, #tpu.memory_space<vmem>>, vector<8x256xf32>
    %c0_1 = arith.constant 0 : index
    %c0_2 = arith.constant 0 : index
    %1 = vector.load %arg3[%c0_1, %c0_2] : memref<8x256xf32, #tpu.memory_space<vmem>>, vector<8x256xf32>
    %2 = arith.addf %0, %1 : vector<8x256xf32>
    %c8_i32 = arith.constant 8 : i32
    %3 = arith.muli %arg0, %c8_i32 : i32
    %c0_3 = arith.constant 0 : index
    %4 = memref.load %arg1[%c0_3] : memref<1xi32, #tpu.memory_space<smem>>
    %5 = tpu.iota {dimensions = array<i32: 0>} : vector<8x256xi32>
    %6 = vector.broadcast %3 : i32 to vector<8x256xi32>
    %7 = arith.addi %5, %6 : vector<8x256xi32>
    %8 = tpu.iota {dimensions = array<i32: 1>} : vector<8x256xi32>
    %c256_i32 = arith.constant 256 : i32
    %9 = vector.broadcast %c256_i32 : i32 to vector<8x256xi32>
    %10 = arith.muli %7, %9 : vector<8x256xi32>
    %11 = arith.addi %10, %8 : vector<8x256xi32>
    %c-2048144789_i32 = arith.constant -2048144789 : i32
    %12 = arith.muli %4, %c-2048144789_i32 : i32
    %c1_i32 = arith.constant 1 : i32
    %13 = arith.addi %12, %c1_i32 : i32
    %14 = vector.broadcast %13 : i32 to vector<8x256xi32>
    %15 = arith.xori %11, %14 : vector<8x256xi32>
    %c-1640531535_i32 = arith.constant -1640531535 : i32
    %16 = vector.broadcast %c-1640531535_i32 : i32 to vector<8x256xi32>
    %17 = arith.muli %15, %16 : vector<8x256xi32>
    %c16_i32 = arith.constant 16 : i32
    %18 = vector.broadcast %c16_i32 : i32 to vector<8x256xi32>
    %19 = arith.shrui %17, %18 : vector<8x256xi32>
    %20 = arith.xori %17, %19 : vector<8x256xi32>
    %c-2048144789_i32_4 = arith.constant -2048144789 : i32
    %21 = vector.broadcast %c-2048144789_i32_4 : i32 to vector<8x256xi32>
    %22 = arith.muli %20, %21 : vector<8x256xi32>
    %c13_i32 = arith.constant 13 : i32
    %23 = vector.broadcast %c13_i32 : i32 to vector<8x256xi32>
    %24 = arith.shrui %22, %23 : vector<8x256xi32>
    %25 = arith.xori %22, %24 : vector<8x256xi32>
    %c-1028477387_i32 = arith.constant -1028477387 : i32
    %26 = vector.broadcast %c-1028477387_i32 : i32 to vector<8x256xi32>
    %27 = arith.muli %25, %26 : vector<8x256xi32>
    %c16_i32_5 = arith.constant 16 : i32
    %28 = vector.broadcast %c16_i32_5 : i32 to vector<8x256xi32>
    %29 = arith.shrui %27, %28 : vector<8x256xi32>
    %30 = arith.xori %27, %29 : vector<8x256xi32>
    %c-429496730_i32 = arith.constant -429496730 : i32
    %31 = vector.broadcast %c-429496730_i32 : i32 to vector<8x256xi32>
    %32 = arith.cmpi ult, %30, %31 : vector<8x256xi32>
    %cst = arith.constant 0.000000e+00 : f32
    %33 = vector.broadcast %cst : f32 to vector<8x256xf32>
    %34 = arith.select %32, %2, %33 : vector<8x256xi1>, vector<8x256xf32>
    %cst_6 = arith.constant 1.11111116 : f32
    %35 = vector.broadcast %cst_6 : f32 to vector<8x256xf32>
    %36 = arith.mulf %34, %35 : vector<8x256xf32>
    %c0_7 = arith.constant 0 : index
    %c0_8 = arith.constant 0 : index
    %37 = vector.load %arg4[%c0_7, %c0_8] : memref<8x256xf32, #tpu.memory_space<vmem>>, vector<8x256xf32>
    tpu.vector_store %arg4[%c0_7, %c0_8], %36 {strides = array<i32>} : memref<8x256xf32, #tpu.memory_space<vmem>>, vector<8x256xf32>,
    return
  }
  func.func @transform_0(%arg0: i32, %arg1: memref<1xi32, #tpu.memory_space<smem>>) -> (i32, i32) {
    %c0_i32 = arith.constant 0 : i32
    %c0_i32_0 = arith.constant 0 : i32
    return %arg0, %c0_i32 : i32, i32
  }
  func.func @transform_1(%arg0: i32, %arg1: memref<1xi32, #tpu.memory_space<smem>>) -> (i32, i32) {
    %c0_i32 = arith.constant 0 : i32
    %c0_i32_0 = arith.constant 0 : i32
    return %arg0, %c0_i32 : i32, i32
  }
  func.func @transform_2(%arg0: i32, %arg1: memref<1xi32, #tpu.memory_space<smem>>) -> (i32, i32) {
    %c0_i32 = arith.constant 0 : i32
    %c0_i32_0 = arith.constant 0 : i32
    return %arg0, %c0_i32 : i32, i32
  }
}

</mosaic_0001>

<bundles_post_ra>
// kernel: tpu_custom_call.1
= control target key start
LH: loop header
LB: loop body
LE: loop exit
PB: predicated region body
PF: predicated region fallthrough
CT: control target
= control target key end

     0   :  { %9 = vsyncpa [#allocation5], 0  ;;  %s240_s0 = inlined_call_operand.<no memory space> [shape: s32[1], index: 0, kind: input, shape index: {}]   ;;  %s241_s1 = inlined_call_operand.hbm [shape: f32[8,256], index: 1, kind: input, shape index: {}]   ;;  %s242_s2 = inlined_call_operand.hbm [shape: f32[8,256], index: 2, kind: input, shape index: {}]   ;;  %s243_s3 = inlined_call_operand.hbm [shape: f32[8,256], index: 3, kind: output, shape index: {}]  }
   0x1   :  { %10 = vsyncpa [#allocation8], 0 }
   0x2   :  { %11 = vsyncpa [#allocation6], 0  ;;  %s178_s12 = smov [#allocation4]   ;;  %s179_s14 = smov [#allocation7]  }
   0x3   :  { %s18_s13 = sshll.u32 %s178_s12, 4  ;;  %s28_s15 = sshll.u32 %s179_s14, 4  ;;  %s19_s13 = int_to_ptr.vmem [resolvable:$true] %s18_s13  ;;  %s29_s15 = int_to_ptr.vmem [resolvable:$true] %s28_s15 }
   0x4   :  { %s106_s18 = scalar_lea.hbm %s241_s1, 256 }
   0x5   :  { %p107_p0 = scmp.ne.s32.totalorder %s241_s1, %s106_s18  ;;  %p110_p1 = scmp.lt.u32.totalorder %s106_s18, %s241_s1 }
   0x7   :  { %p112_p2 = pnand %p110_p1, %p107_p0 }
   0x9   :  { %115 = shalt.err (!%p112_p2)
}
   0xa   :  { %s116_s23 = scalar_lea.vmem %s19_s13, 256  ;;  %p121_p4 = scmp.lt.s32.totalorder %s19_s13, %s19_s13 }
   0xb   :  { %p117_p3 = scmp.ne.s32.totalorder %s19_s13, %s116_s23  ;;  %p122_p5 = scmp.lt.s32.totalorder %s116_s23, %s116_s23 }
   0xd   :  { %p123_p6 = por %p122_p5, %p121_p4 }
   0xf   :  { %p124_p7 = pnand %p123_p6, %p117_p3 }
  0x11   :  { %127 = shalt.err (!%p124_p7)
}
  0x12   :  { %21 = dma.hbm_to_vmem [thread:$0]  %s241_s1, 256, %s19_s13, [#allocation5]  }
  0x13   :  { %s128_s28 = scalar_lea.hbm %s242_s2, 256 }
  0x14   :  { %p129_p8 = scmp.ne.s32.totalorder %s242_s2, %s128_s28  ;;  %p132_p9 = scmp.lt.u32.totalorder %s128_s28, %s242_s2 }
  0x16   :  { %p134_p10 = pnand %p132_p9, %p129_p8 }
  0x18   :  { %137 = shalt.err (!%p134_p10)
}
  0x19   :  { %s138_s6 = scalar_lea.vmem %s29_s15, 256  ;;  %p143_p12 = scmp.lt.s32.totalorder %s29_s15, %s29_s15 }
  0x1a   :  { %p139_p11 = scmp.ne.s32.totalorder %s29_s15, %s138_s6  ;;  %p144_p13 = scmp.lt.s32.totalorder %s138_s6, %s138_s6 }
  0x1c   :  { %p145_p0 = por %p144_p13, %p143_p12 }
  0x1e   :  { %p146_p1 = pnand %p145_p0, %p139_p11 }
  0x20   :  { %149 = shalt.err (!%p146_p1)
}
  0x21   :  { %31 = dma.hbm_to_vmem [thread:$0]  %s242_s2, 256, %s29_s15, [#allocation8]  }
  0x22   :  { %172 = dma.done.wait [#allocation5], 256  }
  0x23   :  { %173 = vsyncadd [#allocation5], 4294967040 }
  0x24   :  { %174 = dma.done.wait [#allocation8], 256  }
  0x25   :  { %175 = vsyncadd [#allocation8], 4294967040  ;;  %v46_v0 = vlaneseq  ;;  %s56_s10 = smul.u32 2246822507, %s240_s0  ;;  %v38_v22 = vld [vmem:[#allocation4] sm:$0xff]  ;;  %v40_v23 = vld [vmem:[#allocation7] sm:$0xff] }
  0x26   :  { %v39_v25 = vld [vmem:[#allocation4 + $0x8] sm:$0xff]  ;;  %v41_v26 = vld [vmem:[#allocation7 + $0x8] sm:$0xff]  ;;  %v42_v30 = vadd.f32 %v40_v23, %v38_v22  ;;  %s180_s0 = smov [#allocation9]  }
  0x27   :  { %v47_v1 = vshrl.u32 %v46_v0, 7  ;;  %v51_v2 = vand.u32 127, %v46_v0  ;;  %s57_s11 = sadd.s32 1, %s56_s10  ;;  %v43_v31 = vadd.f32 %v41_v26, %v39_v25  ;;  %s93_s2 = sshll.u32 %s180_s0, 4  ;;  %s94_s2 = int_to_ptr.vmem [resolvable:$true] %s93_s2 }
  0x28   :  { %v58_v5 = vstv %s57_s11  ;;  %s150_s12 = scalar_lea.vmem %s94_s2, 256  ;;  %p155_p3 = scmp.lt.s32.totalorder %s94_s2, %s94_s2 }
  0x29   :  { %v53_v3 = vmul.u32 256, %v47_v1  ;;  %v52_v4 = vadd.s32 128, %v51_v2  ;;  %p151_p2 = scmp.ne.s32.totalorder %s94_s2, %s150_s12  ;;  %p156_p4 = scmp.lt.s32.totalorder %s150_s12, %s150_s12 }
  0x2b   :  { %v54_v6 = vadd.s32 %v53_v3, %v51_v2  ;;  %v55_v7 = vadd.s32 %v53_v3, %v52_v4  ;;  %p157_p5 = por %p156_p4, %p155_p3 }
  0x2d   :  { %v59_v8 = vxor.u32 %v58_v5, %v54_v6  ;;  %v60_v9 = vxor.u32 %v58_v5, %v55_v7  ;;  %p158_p6 = pnand %p157_p5, %p151_p2 }
  0x2f   :  { %v61_v10 = vmul.u32 2654435761, %v59_v8  ;;  %v62_v11 = vmul.u32 2654435761, %v60_v9 }
  0x31   :  { %v63_v12 = vshrl.u32 %v61_v10, 16  ;;  %v64_v13 = vshrl.u32 %v62_v11, 16 }
  0x33   :  { %v65_v14 = vxor.u32 %v63_v12, %v61_v10  ;;  %v66_v15 = vxor.u32 %v64_v13, %v62_v11 }
  0x35   :  { %v67_v16 = vmul.u32 2246822507, %v65_v14  ;;  %v68_v17 = vmul.u32 2246822507, %v66_v15 }
  0x37   :  { %v69_v18 = vshrl.u32 %v67_v16, 13  ;;  %v70_v19 = vshrl.u32 %v68_v17, 13 }
  0x39   :  { %v71_v20 = vxor.u32 %v69_v18, %v67_v16  ;;  %v72_v21 = vxor.u32 %v70_v19, %v68_v17 }
  0x3b   :  { %v73_v24 = vmul.u32 3266489909, %v71_v20  ;;  %v74_v27 = vmul.u32 3266489909, %v72_v21 }
  0x3d   :  { %v75_v28 = vshrl.u32 %v73_v24, 16  ;;  %v76_v29 = vshrl.u32 %v74_v27, 16 }
  0x3f   :  { %v77_v32 = vxor.u32 %v75_v28, %v73_v24  ;;  %v78_v33 = vxor.u32 %v76_v29, %v74_v27 }
  0x41   :  { %vm79_vm0 = vcmp.lt.u32.totalorder %v77_v32, 3865470566  ;;  %vm80_vm1 = vcmp.lt.u32.totalorder %v78_v33, 3865470566 }
  0x42   :  { %v81_v34 = vsel %vm79_vm0, %v42_v30, 0.0  ;;  %v82_v35 = vsel %vm80_vm1, %v43_v31, 0.0 }
  0x43   :  { %v83_v36 = vmul.f32 1.1111112, %v81_v34  ;;  %v84_v37 = vmul.f32 1.1111112, %v82_v35 }
  0x45   :  { %85 = vst [vmem:[#allocation9] sm:$0xff] %v83_v36  ;;  %86 = vst [vmem:[#allocation9 + $0x8] sm:$0xff] %v84_v37 }
  0x46   :  { %161 = shalt.err (!%p158_p6)
}
  0x47   :  { %s162_s15 = scalar_lea.hbm %s243_s3, 256 }
  0x48   :  { %p163_p7 = scmp.ne.s32.totalorder %s243_s3, %s162_s15  ;;  %p166_p8 = scmp.lt.u32.totalorder %s162_s15, %s243_s3 }
  0x4a   :  { %p168_p9 = pnand %p166_p8, %p163_p7 }
  0x4c   :  { %171 = shalt.err (!%p168_p9)
}
  0x4d   :  { %96 = dma.vmem_to_hbm [thread:$0]  %s94_s2, 256, %s243_s3, [#allocation6]  }
  0x4e   :  { %176 = dma.done.wait [#allocation6], 256  }
  0x4f   :  { %177 = vsyncadd [#allocation6], 4294967040 }
  0x50   :  { %100 = vsyncpa [#allocation5], 1 }
  0x51   :  { %101 = vsyncpa [#allocation8], 1 }
  0x52   :  { %102 = vsyncpa [#allocation6], 1 }

</bundles_post_ra>
